<compile_context>
chip_gen: v7x
topology: tpu7x:2x2x1
jax: 0.10.0
libtpu: 0.0.40
codegen_flags: <defaults>
</compile_context>

<pallas_src>
import jax
import jax.numpy as jnp
from jax.experimental import pallas as pl
from jax.experimental.pallas import tpu as pltpu

EPS = 1e-5


def _bn_relu(h, gb):
    """Train-mode BatchNorm1d + ReLU over the batch axis, folded to one FMA.

    h:  (N, F) f32 pre-activation.
    gb: (2, F) f32, row 0 = gamma, row 1 = beta.
    """
    inv_n = 1.0 / h.shape[0]
    mean = jnp.sum(h, axis=0, keepdims=True) * inv_n
    hc = h - mean                                     # centered -> var >= 0 by construction
    var = jnp.sum(hc * hc, axis=0, keepdims=True) * inv_n
    scale = gb[0:1, :] * jax.lax.rsqrt(var + EPS)     # rsqrt -> EUP slot (nearly free)
    return jnp.maximum(hc * scale + gb[1:2, :], 0.0)


def _fused_resblock_kernel(x_ref, w1_ref, w2_ref, gb1_ref, gb2_ref, o_ref, h1_ref):
    """Grid = (stage-2 feature tiles j,).

    x / W1 / gb1 are VMEM-resident; W2 / gb2 / out are streamed per lane-dense feature
    tile; the stage-1 output h1 persists in a bf16 VMEM scratch across grid steps.
    """
    j = pl.program_id(0)
    tn = o_ref.shape[1]

    # Stage 1 (whole (N, D) block) computed once, at the first grid step, into the
    # persistent bf16 scratch.  Linear bias omitted: cancelled by BN mean subtraction.
    @pl.when(j == 0)
    def _stage1():
        h = jnp.dot(x_ref[...].astype(jnp.bfloat16), w1_ref[...],
                    preferred_element_type=jnp.float32)
        h1_ref[...] = _bn_relu(h, gb1_ref[...]).astype(h1_ref.dtype)

    # Stage 2 for feature tile j: full-D contraction in one MXU dot (no K grid axis).
    h2 = jnp.dot(h1_ref[...], w2_ref[...], preferred_element_type=jnp.float32)
    h2 = _bn_relu(h2, gb2_ref[...])

    # Residual from the already-resident f32 x (lane-aligned dynamic slice).
    start = pl.multiple_of(j * tn, tn)
    o_ref[...] = (h2 + x_ref[:, pl.ds(start, tn)]).astype(o_ref.dtype)


def _pick_tile(dim: int) -> int:
    # 256 matches the v6e/v7x MXU width; fall back to a full block for small/odd dims.
    for t in (256, 128):
        if dim % t == 0:
            return t
    return dim


def _vmem_capacity_bytes() -> int:
    try:
        return int(pltpu.get_tpu_info().vmem_capacity_bytes)
    except Exception:
        return 64 * 1024 * 1024   # conservative: v7x physical VMEM per TensorCore


def prepare_params(params):
    """One-time weight prep (hoisted out of the per-call path):
      * Linear weights transposed to (in, out) layout and cast to bf16.
      * gamma/beta packed into one (2, D) f32 array per BN layer.
      * Linear biases dropped: exactly cancelled by train-mode BN mean subtraction.
    """
    return {
        "w1_t": jnp.asarray(params["w1"]).T.astype(jnp.bfloat16),
        "w2_t": jnp.asarray(params["w2"]).T.astype(jnp.bfloat16),
        "gb1": jnp.stack([params["g1"], params["be1"]]).astype(jnp.float32),
        "gb2": jnp.stack([params["g2"], params["be2"]]).astype(jnp.float32),
    }


@jax.jit
def resblock(x, prep):
    """x: (N, D) float32.  prep: output of prepare_params."""
    n, d = x.shape
    w1_t, w2_t, gb1, gb2 = prep["w1_t"], prep["w2_t"], prep["gb1"], prep["gb2"]
    tn = _pick_tile(d)
    grid = (d // tn,)

    in_specs = [
        pl.BlockSpec((n, d), lambda j: (0, 0)),    # x: resident (matmul LHS + residual)
        pl.BlockSpec((d, d), lambda j: (0, 0)),    # W1: resident, consumed at j == 0
        pl.BlockSpec((d, tn), lambda j: (0, j)),   # W2: streamed per feature tile
        pl.BlockSpec((2, d), lambda j: (0, 0)),    # packed gamma/beta, stage 1
        pl.BlockSpec((2, tn), lambda j: (0, j)),   # packed gamma/beta, stage 2
    ]
    out_spec = pl.BlockSpec((n, tn), lambda j: (0, j))

    # VMEM budget: resident x + W1 + gb1, double-buffered W2/gb2/out, bf16 h1 scratch.
    need = (n * d * 4 + d * d * 2 + 2 * d * 4
            + 2 * (d * tn * 2 + 2 * tn * 4 + n * tn * 4)
            + n * d * 2)
    vmem_limit = int(min(max(2 * need, 16 * 1024 * 1024),
                         0.75 * _vmem_capacity_bytes()))

    bytes_accessed = (n * d * 4            # x, read once (resident)
                      + 2 * d * d * 2      # W1 + W2, bf16, read once each
                      + 2 * 2 * d * 4      # packed gamma/beta
                      + n * d * 4)         # output
    cost = pl.CostEstimate(flops=4 * n * d * d + 16 * n * d,
                           transcendentals=2 * d,
                           bytes_accessed=bytes_accessed)

    return pl.pallas_call(
        _fused_resblock_kernel,
        out_shape=jax.ShapeDtypeStruct((n, d), x.dtype),
        grid=grid,
        in_specs=in_specs,
        out_specs=out_spec,
        scratch_shapes=[pltpu.VMEM((n, d), jnp.bfloat16)],   # h1 (stage-1 output)
        compiler_params=pltpu.CompilerParams(
            # "arbitrary": later feature tiles read the h1 scratch written at j == 0.
            dimension_semantics=("arbitrary",),
            vmem_limit_bytes=vmem_limit,
        ),
        cost_estimate=cost,
    )(x, w1_t, w2_t, gb1, gb2)


def init_params(key, dim):
    k1, k2, k3, k4 = jax.random.split(key, 4)
    bound = 1.0 / jnp.sqrt(dim)
    return {
        # Linear layers in PyTorch layout (out, in) with biases (biases are kept here
        # for reference fidelity; the kernel drops them since BN cancels them exactly).
        "w1": jax.random.uniform(k1, (dim, dim), jnp.float32, -bound, bound),
        "b1": jax.random.uniform(k2, (dim,), jnp.float32, -bound, bound),
        "w2": jax.random.uniform(k3, (dim, dim), jnp.float32, -bound, bound),
        "b2": jax.random.uniform(k4, (dim,), jnp.float32, -bound, bound),
        # BatchNorm affine params: gamma=1, beta=0 (PyTorch default).
        "g1": jnp.ones((dim,), jnp.float32),
        "be1": jnp.zeros((dim,), jnp.float32),
        "g2": jnp.ones((dim,), jnp.float32),
        "be2": jnp.zeros((dim,), jnp.float32),
    }


def resblock_ref(x, params):
    """Pure-JAX reference (same bf16-matmul / f32-BN numerics; keeps the Linear bias)."""

    def bn_relu(h, g, b):
        m = jnp.mean(h, axis=0, keepdims=True)
        v = jnp.mean(jnp.square(h - m), axis=0, keepdims=True)
        return jnp.maximum((h - m) * jax.lax.rsqrt(v + EPS) * g + b, 0.0)

    def lin(a, w, b):
        return jnp.dot(a.astype(jnp.bfloat16), w.T.astype(jnp.bfloat16),
                       preferred_element_type=jnp.float32) + b

    h = bn_relu(lin(x, params["w1"], params["b1"]), params["g1"], params["be1"])
    h = bn_relu(lin(h.astype(jnp.bfloat16), params["w2"], params["b2"]),
                params["g2"], params["be2"])
    return h + x


if __name__ == "__main__":
    key = jax.random.PRNGKey(0)
    kx, kp = jax.random.split(key)

    # Lane/MXU-friendly small demo: batch multiple of 8, dim multiple of 256.
    batch, dim = 64, 256
    x = jax.random.normal(kx, (batch, dim), jnp.float32)
    params = init_params(kp, dim)
    prep = prepare_params(params)      # weight transpose/cast hoisted out of the call path

    out = jax.block_until_ready(resblock(x, prep))
    ref = resblock_ref(x, params)

    assert out.shape == (batch, dim)
    assert bool(jnp.all(jnp.isfinite(out))), "non-finite output"
    assert jnp.allclose(out, ref, atol=1e-2, rtol=1e-2), "mismatch vs JAX reference"

    print("KERNEL_OK")
</pallas_src>

<mosaic_0001>
module attributes {stable_mosaic.version = 11 : i64} {
  func.func @_fused_resblock_kernel(%arg0: i32, %arg1: memref<64x256xf32, #tpu.memory_space<vmem>>, %arg2: memref<256x256xbf16, #tpu.memory_space<vmem>>, %arg3: memref<256x256xbf16, #tpu.memory_space<vmem>>, %arg4: memref<2x256xf32, #tpu.memory_space<vmem>>, %arg5: memref<2x256xf32, #tpu.memory_space<vmem>>, %arg6: memref<64x256xf32, #tpu.memory_space<vmem>>, %arg7: memref<64x256xbf16, #tpu.memory_space<vmem>>) attributes {dimension_semantics = [#tpu.dimension_semantics<arbitrary>], iteration_bounds = array<i64: 1>, scalar_prefetch = 0 : i64, scratch_operands = 1 : i64, tpu.core_type = #tpu.core_type<tc>, window_params = [{pipeline_mode = #tpu.pipeline_mode<synchronous>, transform_indices = @transform_0, window_bounds = array<i64: 64, 256>}, {pipeline_mode = #tpu.pipeline_mode<synchronous>, transform_indices = @transform_1, window_bounds = array<i64: 256, 256>}, {transform_indices = @transform_2, window_bounds = array<i64: 256, 256>}, {pipeline_mode = #tpu.pipeline_mode<synchronous>, transform_indices = @transform_3, window_bounds = array<i64: 2, 256>}, {transform_indices = @transform_4, window_bounds = array<i64: 2, 256>}, {transform_indices = @transform_5, window_bounds = array<i64: 64, 256>}]} {
    %c0_i32 = arith.constant 0 : i32
    %0 = arith.cmpi eq, %arg0, %c0_i32 : i32
    %1 = arith.extui %0 : i1 to i32
    %c0_i32_0 = arith.constant 0 : i32
    %2 = arith.cmpi ne, %1, %c0_i32_0 : i32
    scf.if %2 {
      %c0_15 = arith.constant 0 : index
      %c0_16 = arith.constant 0 : index
      %36 = vector.load %arg1[%c0_15, %c0_16] : memref<64x256xf32, #tpu.memory_space<vmem>>, vector<64x256xf32>
      %37 = arith.truncf %36 : vector<64x256xf32> to vector<64x256xbf16>
      %c0_17 = arith.constant 0 : index
      %c0_18 = arith.constant 0 : index
      %38 = vector.load %arg2[%c0_17, %c0_18] : memref<256x256xbf16, #tpu.memory_space<vmem>>, vector<256x256xbf16>
      %cst_19 = arith.constant dense<0.000000e+00> : vector<64x256xf32>
      %39 = tpu.matmul %37, %38, %cst_19 {dimension_numbers = #tpu.dot_dimension_numbers<[1], [0], [0], [1], [0, 0, 1, 1], [], []>} : vector<64x256xbf16>, vector<256x256xbf16>, vector<64x256xf32> -> vector<64x256xf32>
      %c0_20 = arith.constant 0 : index
      %c0_21 = arith.constant 0 : index
      %40 = vector.load %arg4[%c0_20, %c0_21] : memref<2x256xf32, #tpu.memory_space<vmem>>, vector<2x256xf32>
      %cst_22 = arith.constant dense<0.000000e+00> : vector<256xf32>
      %41 = vector.multi_reduction <add>, %39, %cst_22 [0] : vector<64x256xf32> to vector<256xf32>
      %42 = vector.shape_cast %41 : vector<256xf32> to vector<1x256xf32>
      %cst_23 = arith.constant 1.562500e-02 : f32
      %43 = vector.broadcast %cst_23 : f32 to vector<1x256xf32>
      %44 = arith.mulf %42, %43 : vector<1x256xf32>
      %45 = vector.broadcast %44 : vector<1x256xf32> to vector<64x256xf32>
      %46 = arith.subf %39, %45 : vector<64x256xf32>
      %47 = arith.mulf %46, %46 : vector<64x256xf32>
      %cst_24 = arith.constant dense<0.000000e+00> : vector<256xf32>
      %48 = vector.multi_reduction <add>, %47, %cst_24 [0] : vector<64x256xf32> to vector<256xf32>
      %49 = vector.shape_cast %48 : vector<256xf32> to vector<1x256xf32>
      %cst_25 = arith.constant 1.562500e-02 : f32
      %50 = vector.broadcast %cst_25 : f32 to vector<1x256xf32>
      %51 = arith.mulf %49, %50 : vector<1x256xf32>
      %52 = vector.extract_strided_slice %40 {offsets = [0, 0], sizes = [1, 256], strides = [1, 1]} : vector<2x256xf32> to vector<1x256xf32>
      %cst_26 = arith.constant 9.99999974E-6 : f32
      %53 = vector.broadcast %cst_26 : f32 to vector<1x256xf32>
      %54 = arith.addf %51, %53 : vector<1x256xf32>
      %55 = math.rsqrt %54 : vector<1x256xf32>
      %56 = arith.mulf %52, %55 : vector<1x256xf32>
      %57 = vector.broadcast %56 : vector<1x256xf32> to vector<64x256xf32>
      %58 = arith.mulf %46, %57 : vector<64x256xf32>
      %59 = vector.extract_strided_slice %40 {offsets = [1, 0], sizes = [1, 256], strides = [1, 1]} : vector<2x256xf32> to vector<1x256xf32>
      %60 = vector.broadcast %59 : vector<1x256xf32> to vector<64x256xf32>
      %61 = arith.addf %58, %60 : vector<64x256xf32>
      %cst_27 = arith.constant 0.000000e+00 : f32
      %62 = vector.broadcast %cst_27 : f32 to vector<64x256xf32>
      %63 = arith.maximumf %61, %62 : vector<64x256xf32>
      %64 = arith.truncf %63 : vector<64x256xf32> to vector<64x256xbf16>
      %c0_28 = arith.constant 0 : index
      %c0_29 = arith.constant 0 : index
      %65 = vector.load %arg7[%c0_28, %c0_29] : memref<64x256xbf16, #tpu.memory_space<vmem>>, vector<64x256xbf16>
      tpu.vector_store %arg7[%c0_28, %c0_29], %64 {strides = array<i32>} : memref<64x256xbf16, #tpu.memory_space<vmem>>, vector<64x256xbf16>,
    } else {
    }
    %c0 = arith.constant 0 : index
    %c0_1 = arith.constant 0 : index
    %3 = vector.load %arg7[%c0, %c0_1] : memref<64x256xbf16, #tpu.memory_space<vmem>>, vector<64x256xbf16>
    %c0_2 = arith.constant 0 : index
    %c0_3 = arith.constant 0 : index
    %4 = vector.load %arg3[%c0_2, %c0_3] : memref<256x256xbf16, #tpu.memory_space<vmem>>, vector<256x256xbf16>
    %cst = arith.constant dense<0.000000e+00> : vector<64x256xf32>
    %5 = tpu.matmul %3, %4, %cst {dimension_numbers = #tpu.dot_dimension_numbers<[1], [0], [0], [1], [0, 0, 1, 1], [], []>} : vector<64x256xbf16>, vector<256x256xbf16>, vector<64x256xf32> -> vector<64x256xf32>
    %c0_4 = arith.constant 0 : index
    %c0_5 = arith.constant 0 : index
    %6 = vector.load %arg5[%c0_4, %c0_5] : memref<2x256xf32, #tpu.memory_space<vmem>>, vector<2x256xf32>
    %cst_6 = arith.constant dense<0.000000e+00> : vector<256xf32>
    %7 = vector.multi_reduction <add>, %5, %cst_6 [0] : vector<64x256xf32> to vector<256xf32>
    %8 = vector.shape_cast %7 : vector<256xf32> to vector<1x256xf32>
    %cst_7 = arith.constant 1.562500e-02 : f32
    %9 = vector.broadcast %cst_7 : f32 to vector<1x256xf32>
    %10 = arith.mulf %8, %9 : vector<1x256xf32>
    %11 = vector.broadcast %10 : vector<1x256xf32> to vector<64x256xf32>
    %12 = arith.subf %5, %11 : vector<64x256xf32>
    %13 = arith.mulf %12, %12 : vector<64x256xf32>
    %cst_8 = arith.constant dense<0.000000e+00> : vector<256xf32>
    %14 = vector.multi_reduction <add>, %13, %cst_8 [0] : vector<64x256xf32> to vector<256xf32>
    %15 = vector.shape_cast %14 : vector<256xf32> to vector<1x256xf32>
    %cst_9 = arith.constant 1.562500e-02 : f32
    %16 = vector.broadcast %cst_9 : f32 to vector<1x256xf32>
    %17 = arith.mulf %15, %16 : vector<1x256xf32>
    %18 = vector.extract_strided_slice %6 {offsets = [0, 0], sizes = [1, 256], strides = [1, 1]} : vector<2x256xf32> to vector<1x256xf32>
    %cst_10 = arith.constant 9.99999974E-6 : f32
    %19 = vector.broadcast %cst_10 : f32 to vector<1x256xf32>
    %20 = arith.addf %17, %19 : vector<1x256xf32>
    %21 = math.rsqrt %20 : vector<1x256xf32>
    %22 = arith.mulf %18, %21 : vector<1x256xf32>
    %23 = vector.broadcast %22 : vector<1x256xf32> to vector<64x256xf32>
    %24 = arith.mulf %12, %23 : vector<64x256xf32>
    %25 = vector.extract_strided_slice %6 {offsets = [1, 0], sizes = [1, 256], strides = [1, 1]} : vector<2x256xf32> to vector<1x256xf32>
    %26 = vector.broadcast %25 : vector<1x256xf32> to vector<64x256xf32>
    %27 = arith.addf %24, %26 : vector<64x256xf32>
    %cst_11 = arith.constant 0.000000e+00 : f32
    %28 = vector.broadcast %cst_11 : f32 to vector<64x256xf32>
    %29 = arith.maximumf %27, %28 : vector<64x256xf32>
    %c256_i32 = arith.constant 256 : i32
    %30 = arith.muli %arg0, %c256_i32 : i32
    %31 = tpu.assume_multiple %30, 256 : i32
    %c0_12 = arith.constant 0 : index
    %32 = arith.index_cast %31 : i32 to index
    %33 = vector.load %arg1[%c0_12, %32] : memref<64x256xf32, #tpu.memory_space<vmem>>, vector<64x256xf32>
    %34 = arith.addf %29, %33 : vector<64x256xf32>
    %c0_13 = arith.constant 0 : index
    %c0_14 = arith.constant 0 : index
    %35 = vector.load %arg6[%c0_13, %c0_14] : memref<64x256xf32, #tpu.memory_space<vmem>>, vector<64x256xf32>
    tpu.vector_store %arg6[%c0_13, %c0_14], %34 {strides = array<i32>} : memref<64x256xf32, #tpu.memory_space<vmem>>, vector<64x256xf32>,
    return
  }
  func.func @transform_0(%arg0: i32) -> (i32, i32) {
    %c0_i32 = arith.constant 0 : i32
    %c0_i32_0 = arith.constant 0 : i32
    %c0_i32_1 = arith.constant 0 : i32
    return %c0_i32, %c0_i32_0 : i32, i32
  }
  func.func @transform_1(%arg0: i32) -> (i32, i32) {
    %c0_i32 = arith.constant 0 : i32
    %c0_i32_0 = arith.constant 0 : i32
    %c0_i32_1 = arith.constant 0 : i32
    return %c0_i32, %c0_i32_0 : i32, i32
  }
  func.func @transform_2(%arg0: i32) -> (i32, i32) {
    %c0_i32 = arith.constant 0 : i32
    %c0_i32_0 = arith.constant 0 : i32
    return %c0_i32, %arg0 : i32, i32
  }
  func.func @transform_3(%arg0: i32) -> (i32, i32) {
    %c0_i32 = arith.constant 0 : i32
    %c0_i32_0 = arith.constant 0 : i32
    %c0_i32_1 = arith.constant 0 : i32
    return %c0_i32, %c0_i32_0 : i32, i32
  }
  func.func @transform_4(%arg0: i32) -> (i32, i32) {
    %c0_i32 = arith.constant 0 : i32
    %c0_i32_0 = arith.constant 0 : i32
    return %c0_i32, %arg0 : i32, i32
  }
  func.func @transform_5(%arg0: i32) -> (i32, i32) {
    %c0_i32 = arith.constant 0 : i32
    %c0_i32_0 = arith.constant 0 : i32
    return %c0_i32, %arg0 : i32, i32
  }
}

</mosaic_0001>

<bundles_post_ra>
// kernel: resblock.1
= control target key start
LH: loop header
LB: loop body
LE: loop exit
PB: predicated region body
PF: predicated region fallthrough
CT: control target
= control target key end

     0   :  { %10 = vsyncpa [#allocation4], 0  ;;  %s1776_s0 = inlined_call_operand.hbm [shape: f32[64,256], index: 0, kind: input, shape index: {}]   ;;  %s1777_s1 = inlined_call_operand.hbm [shape: bf16[256,256], index: 1, kind: input, shape index: {}]   ;;  %s1778_s2 = inlined_call_operand.hbm [shape: bf16[256,256], index: 2, kind: input, shape index: {}]   ;;  %s1779_s3 = inlined_call_operand.hbm [shape: f32[2,256], index: 3, kind: input, shape index: {}]   ;;  %s1780_s4 = inlined_call_operand.vmem [shape: f32[2,256], index: 4, kind: input, shape index: {}]   ;;  %s1781_s5 = inlined_call_operand.hbm [shape: f32[64,256], index: 5, kind: output, shape index: {}]  }
   0x1   :  { %11 = vsyncpa [#allocation7], 0 }
   0x2   :  { %12 = vsyncpa [#allocation10], 0 }
   0x3   :  { %13 = vsyncpa [#allocation5], 0  ;;  %s1410_s18 = smov [#allocation6]   ;;  %s1292_s22 = scalar_lea.hbm %s1777_s1, 4096 }
   0x4   :  { %s31_s19 = sshll.u32 %s1410_s18, 4  ;;  %p1293_p0 = scmp.ne.s32.totalorder %s1777_s1, %s1292_s22  ;;  %s32_s19 = int_to_ptr.vmem [resolvable:$true] %s31_s19 }
   0x5   :  { %p1296_p1 = scmp.lt.u32.totalorder %s1292_s22, %s1777_s1 }
   0x7   :  { %p1298_p2 = pnand %p1296_p1, %p1293_p0 }
   0x9   :  { %1301 = shalt.err (!%p1298_p2)
}
   0xa   :  { %s1302_s27 = scalar_lea.vmem %s32_s19, 4096  ;;  %p1307_p4 = scmp.lt.s32.totalorder %s32_s19, %s32_s19 }
   0xb   :  { %p1303_p3 = scmp.ne.s32.totalorder %s32_s19, %s1302_s27  ;;  %p1308_p5 = scmp.lt.s32.totalorder %s1302_s27, %s1302_s27 }
   0xd   :  { %p1309_p6 = por %p1308_p5, %p1307_p4 }
   0xf   :  { %p1310_p7 = pnand %p1309_p6, %p1303_p3 }
  0x11   :  { %1313 = shalt.err (!%p1310_p7)
}
  0x12   :  { %s1411_s28 = smov 128   ;;  %s1412_s29 = smov 8  }
  0x13   :  { %37 = dma.hbm_to_vmem [thread:$0]  %s1777_s1, 4096, %s32_s19, [#allocation7], %s1411_s28, %s1411_s28, %s1412_s29  }
  0x14   :  { %s1413_s7 = smov [#allocation3]   ;;  %s1314_s11 = scalar_lea.hbm %s1776_s0, 2048 }
  0x15   :  { %s19_s8 = sshll.u32 %s1413_s7, 4  ;;  %p1315_p8 = scmp.ne.s32.totalorder %s1776_s0, %s1314_s11  ;;  %s20_s8 = int_to_ptr.vmem [resolvable:$true] %s19_s8 }
  0x16   :  { %p1318_p9 = scmp.lt.u32.totalorder %s1314_s11, %s1776_s0 }
  0x18   :  { %p1320_p10 = pnand %p1318_p9, %p1315_p8 }
  0x1a   :  { %1323 = shalt.err (!%p1320_p10)
}
  0x1b   :  { %s1324_s16 = scalar_lea.vmem %s20_s8, 2048  ;;  %p1329_p12 = scmp.lt.s32.totalorder %s20_s8, %s20_s8 }
  0x1c   :  { %p1325_p11 = scmp.ne.s32.totalorder %s20_s8, %s1324_s16  ;;  %p1330_p13 = scmp.lt.s32.totalorder %s1324_s16, %s1324_s16 }
  0x1e   :  { %p1331_p0 = por %p1330_p13, %p1329_p12 }
  0x20   :  { %p1332_p1 = pnand %p1331_p0, %p1325_p11 }
  0x22   :  { %1335 = shalt.err (!%p1332_p1)
}
  0x23   :  { %s1414_s1 = smov 256   ;;  %s1415_s17 = smov 16  }
  0x24   :  { %25 = dma.hbm_to_vmem [thread:$0]  %s1776_s0, 2048, %s20_s8, [#allocation4], %s1414_s1, %s1414_s1, %s1415_s17  }
  0x25   :  { %s1416_s20 = smov [#allocation8]   ;;  %s1417_s22 = smov [#allocation9]  }
  0x26   :  { %s43_s21 = sshll.u32 %s1416_s20, 4  ;;  %s56_s23 = sshll.u32 %s1417_s22, 4  ;;  %s44_s21 = int_to_ptr.vmem [resolvable:$true] %s43_s21  ;;  %s57_s23 = int_to_ptr.vmem [resolvable:$true] %s56_s23 }
  0x27   :  { %s1336_s26 = scalar_lea.hbm %s1778_s2, 4096 }
  0x28   :  { %p1337_p2 = scmp.ne.s32.totalorder %s1778_s2, %s1336_s26  ;;  %p1340_p3 = scmp.lt.u32.totalorder %s1336_s26, %s1778_s2 }
  0x2a   :  { %p1342_p4 = pnand %p1340_p3, %p1337_p2 }
  0x2c   :  { %1345 = shalt.err (!%p1342_p4)
}
  0x2d   :  { %s1346_s0 = scalar_lea.vmem %s44_s21, 4096  ;;  %p1351_p6 = scmp.lt.s32.totalorder %s44_s21, %s44_s21 }
  0x2e   :  { %p1347_p5 = scmp.ne.s32.totalorder %s44_s21, %s1346_s0  ;;  %p1352_p7 = scmp.lt.s32.totalorder %s1346_s0, %s1346_s0 }
  0x30   :  { %p1353_p8 = por %p1352_p7, %p1351_p6 }
  0x32   :  { %p1354_p9 = pnand %p1353_p8, %p1347_p5 }
  0x34   :  { %1357 = shalt.err (!%p1354_p9)
}
  0x35   :  { %49 = dma.hbm_to_vmem [thread:$0]  %s1778_s2, 4096, %s44_s21, [#allocation7], %s1411_s28, %s1411_s28, %s1412_s29  }
  0x36   :  { %s1358_s12 = scalar_lea.hbm %s1779_s3, 64 }
  0x37   :  { %p1359_p10 = scmp.ne.s32.totalorder %s1779_s3, %s1358_s12  ;;  %p1362_p11 = scmp.lt.u32.totalorder %s1358_s12, %s1779_s3 }
  0x39   :  { %p1364_p12 = pnand %p1362_p11, %p1359_p10 }
  0x3b   :  { %1367 = shalt.err (!%p1364_p12)
}
  0x3c   :  { %s1368_s18 = scalar_lea.vmem %s57_s23, 64  ;;  %p1373_p0 = scmp.lt.s32.totalorder %s57_s23, %s57_s23 }
  0x3d   :  { %p1369_p13 = scmp.ne.s32.totalorder %s57_s23, %s1368_s18  ;;  %p1374_p1 = scmp.lt.s32.totalorder %s1368_s18, %s1368_s18 }
  0x3f   :  { %p1375_p2 = por %p1374_p1, %p1373_p0 }
  0x41   :  { %p1376_p3 = pnand %p1375_p2, %p1369_p13 }
  0x43   :  { %1379 = shalt.err (!%p1376_p3)
}
  0x44   :  { %59 = dma.hbm_to_vmem [thread:$0]  %s1779_s3, 64, %s57_s23, [#allocation10]  }
  0x45   :  { %1402 = dma.done.wait [#allocation4], 2048  }
  0x46   :  { %1403 = vsyncadd [#allocation4], 4294965248 }
  0x47   :  { %1404 = dma.done.wait [#allocation7], 8192  }
  0x48   :  { %1405 = vsyncadd [#allocation7], 4294959104 }
  0x49   :  { %1406 = dma.done.wait [#allocation10], 64  }
  0x4a   :  { %1407 = vsyncadd [#allocation10], 4294967232  ;;  %v1186_v0 = vld [vmem:[#allocation6 + $0x4] ss:$8 sps:$4 sm:$0xff]   ;;  %v1188_v1 = vld [vmem:[#allocation6] ss:$8 sps:$4 sm:$0xff]  }
  0x4b   :  { %294 = vmatprep.subr.bf16.mxu0 %v1186_v0  ;;  %v1189_v2 = vld [vmem:[#allocation6 + $0x14] ss:$8 sps:$4 sm:$0xff]   ;;  %v1191_v3 = vld [vmem:[#allocation6 + $0x10] ss:$8 sps:$4 sm:$0xff]   ;;  %v1192_v4 = vld [vmem:[#allocation6 + $0x24] ss:$8 sps:$4 sm:$0xff]  }
  0x4c   :  { %295 = vmatpush1.bf16.msra.mxu0 %v1188_v1  ;;  %v1194_v5 = vld [vmem:[#allocation6 + $0x20] ss:$8 sps:$4 sm:$0xff]   ;;  %v1195_v6 = vld [vmem:[#allocation6 + $0x34] ss:$8 sps:$4 sm:$0xff]   ;;  %v1197_v7 = vld [vmem:[#allocation6 + $0x30] ss:$8 sps:$4 sm:$0xff]  }
  0x4d   :  { %296 = vmatprep.subr.bf16.mxu0 %v1189_v2  ;;  %v1198_v8 = vld [vmem:[#allocation6 + $0x44] ss:$8 sps:$4 sm:$0xff]   ;;  %v1200_v9 = vld [vmem:[#allocation6 + $0x40] ss:$8 sps:$4 sm:$0xff]   ;;  %v1201_v10 = vld [vmem:[#allocation6 + $0x54] ss:$8 sps:$4 sm:$0xff]  }
  0x4e   :  { %v1203_v11 = vld [vmem:[#allocation6 + $0x50] ss:$8 sps:$4 sm:$0xff]   ;;  %v1204_v12 = vld [vmem:[#allocation6 + $0x64] ss:$8 sps:$4 sm:$0xff]   ;;  %v1206_v16 = vld [vmem:[#allocation6 + $0x60] ss:$8 sps:$4 sm:$0xff]  }
  0x4f   :  { %v79_v13 = vld [vmem:[#allocation3 + $0x8] sm:$0xff]  ;;  %v81_v14 = vld [vmem:[#allocation3 + $0x18] sm:$0xff]  ;;  %v1507_v35 = vld [vmem:[#allocation3] sm:$0xff] }
  0x50   :  { %297 = vmatpush1.bf16.msra.mxu0 %v1191_v3  ;;  %v95_v15 = vpack.c.bf16 %v81_v14, %v79_v13  ;;  %v1207_v17 = vld [vmem:[#allocation6 + $0x74] ss:$8 sps:$4 sm:$0xff]   ;;  %v1209_v18 = vld [vmem:[#allocation6 + $0x70] ss:$8 sps:$4 sm:$0xff]   ;;  %v1210_v19 = vld [vmem:[#allocation6 + $0x84] ss:$8 sps:$4 sm:$0xff]  }
  0x51   :  { %298 = vmatprep.subr.bf16.mxu0 %v1192_v4  ;;  %v1212_v20 = vld [vmem:[#allocation6 + $0x80] ss:$8 sps:$4 sm:$0xff]   ;;  %v1213_v21 = vld [vmem:[#allocation6 + $0x94] ss:$8 sps:$4 sm:$0xff]   ;;  %v1215_v22 = vld [vmem:[#allocation6 + $0x90] ss:$8 sps:$4 sm:$0xff]  }
  0x52   :  { %326 = vmatprep.mubr.bf16.mxu0 %v95_v15  ;;  %v1216_v23 = vld [vmem:[#allocation6 + $0xa4] ss:$8 sps:$4 sm:$0xff]   ;;  %v1218_v24 = vld [vmem:[#allocation6 + $0xa0] ss:$8 sps:$4 sm:$0xff]   ;;  %v1219_v25 = vld [vmem:[#allocation6 + $0xb4] ss:$8 sps:$4 sm:$0xff]  }
  0x53   :  { %v1221_v26 = vld [vmem:[#allocation6 + $0xb0] ss:$8 sps:$4 sm:$0xff]   ;;  %v1222_v27 = vld [vmem:[#allocation6 + $0xc4] ss:$8 sps:$4 sm:$0xff]   ;;  %v1224_v28 = vld [vmem:[#allocation6 + $0xc0] ss:$8 sps:$4 sm:$0xff]  }
  0x54   :  { %299 = vmatpush1.bf16.msra.mxu0 %v1194_v5  ;;  %v1225_v29 = vld [vmem:[#allocation6 + $0xd4] ss:$8 sps:$4 sm:$0xff]   ;;  %v1227_v30 = vld [vmem:[#allocation6 + $0xd0] ss:$8 sps:$4 sm:$0xff]   ;;  %v1228_v31 = vld [vmem:[#allocation6 + $0xe4] ss:$8 sps:$4 sm:$0xff]  }
  0x55   :  { %300 = vmatprep.subr.bf16.mxu0 %v1195_v6  ;;  %v1230_v32 = vld [vmem:[#allocation6 + $0xe0] ss:$8 sps:$4 sm:$0xff]   ;;  %v1231_v33 = vld [vmem:[#allocation6 + $0xf4] ss:$8 sps:$4 sm:$0xff]   ;;  %v1233_v34 = vld [vmem:[#allocation6 + $0xf0] ss:$8 sps:$4 sm:$0xff]  }
  0x56   :  { %v1509_v36 = vld [vmem:[#allocation3 + $0x10] sm:$0xff]  ;;  %v1511_v37 = vld [vmem:[#allocation3 + $0x28] sm:$0xff]  ;;  %v1513_v38 = vld [vmem:[#allocation3 + $0x38] sm:$0xff] }
  0x57   :  { %v94_v39 = vpack.c.bf16 %v1509_v36, %v1507_v35  ;;  %v97_v40 = vpack.c.bf16 %v1513_v38, %v1511_v37  ;;  %v1519_v41 = vld [vmem:[#allocation3 + $0x20] sm:$0xff]  ;;  %v1521_v42 = vld [vmem:[#allocation3 + $0x30] sm:$0xff]  ;;  %v1523_v43 = vld [vmem:[#allocation3 + $0x48] sm:$0xff] }
  0x58   :  { %301 = vmatpush1.bf16.msra.mxu0 %v1197_v7  ;;  %v1525_v44 = vld [vmem:[#allocation3 + $0x58] sm:$0xff]  ;;  %v96_v45 = vpack.c.bf16 %v1521_v42, %v1519_v41  ;;  %v1531_v47 = vld [vmem:[#allocation3 + $0x40] sm:$0xff]  ;;  %v1533_v48 = vld [vmem:[#allocation3 + $0x50] sm:$0xff] }
  0x59   :  { %302 = vmatprep.subr.bf16.mxu0 %v1198_v8  ;;  %v99_v46 = vpack.c.bf16 %v1525_v44, %v1523_v43  ;;  %v1535_v49 = vld [vmem:[#allocation3 + $0x68] sm:$0xff]  ;;  %v1537_v50 = vld [vmem:[#allocation3 + $0x78] sm:$0xff]  ;;  %v98_v51 = vpack.c.bf16 %v1533_v48, %v1531_v47  ;;  %v1543_v53 = vld [vmem:[#allocation3 + $0x60] sm:$0xff] }
  0x5a   :  { %v101_v52 = vpack.c.bf16 %v1537_v50, %v1535_v49  ;;  %v1545_v54 = vld [vmem:[#allocation3 + $0x70] sm:$0xff]  ;;  %v1234_v56 = vld [vmem:[#allocation8 + $0x4] ss:$8 sps:$4 sm:$0xff]   ;;  %v1236_v57 = vld [vmem:[#allocation8] ss:$8 sps:$4 sm:$0xff]  }
  0x5b   :  { %v100_v55 = vpack.c.bf16 %v1545_v54, %v1543_v53  ;;  %774 = vmatprep.subr.bf16.mxu1 %v1234_v56  ;;  %v1237_v58 = vld [vmem:[#allocation8 + $0x14] ss:$8 sps:$4 sm:$0xff]   ;;  %v1239_v59 = vld [vmem:[#allocation8 + $0x10] ss:$8 sps:$4 sm:$0xff]   ;;  %v1240_v60 = vld [vmem:[#allocation8 + $0x24] ss:$8 sps:$4 sm:$0xff]  }
  0x5c   :  { %303 = vmatpush1.bf16.msra.mxu0 %v1200_v9  ;;  %775 = vmatpush1.bf16.msra.mxu1 %v1236_v57  ;;  %v1242_v61 = vld [vmem:[#allocation8 + $0x20] ss:$8 sps:$4 sm:$0xff]   ;;  %v1243_v62 = vld [vmem:[#allocation8 + $0x34] ss:$8 sps:$4 sm:$0xff]   ;;  %v1245_v63 = vld [vmem:[#allocation8 + $0x30] ss:$8 sps:$4 sm:$0xff]  }
  0x5d   :  { %304 = vmatprep.subr.bf16.mxu0 %v1201_v10  ;;  %776 = vmatprep.subr.bf16.mxu1 %v1237_v58  ;;  %v1246_v0 = vld [vmem:[#allocation8 + $0x44] ss:$8 sps:$4 sm:$0xff]   ;;  %v1248_v1 = vld [vmem:[#allocation8 + $0x40] ss:$8 sps:$4 sm:$0xff]   ;;  %v1249_v2 = vld [vmem:[#allocation8 + $0x54] ss:$8 sps:$4 sm:$0xff]  }
  0x5e   :  { %v1251_v3 = vld [vmem:[#allocation8 + $0x50] ss:$8 sps:$4 sm:$0xff]   ;;  %v1252_v4 = vld [vmem:[#allocation8 + $0x64] ss:$8 sps:$4 sm:$0xff]   ;;  %v1254_v5 = vld [vmem:[#allocation8 + $0x60] ss:$8 sps:$4 sm:$0xff]  }
  0x5f   :  { %v1255_v6 = vld [vmem:[#allocation8 + $0x74] ss:$8 sps:$4 sm:$0xff]   ;;  %v1257_v7 = vld [vmem:[#allocation8 + $0x70] ss:$8 sps:$4 sm:$0xff]   ;;  %v1258_v8 = vld [vmem:[#allocation8 + $0x84] ss:$8 sps:$4 sm:$0xff]  }
  0x60   :  { %305 = vmatpush1.bf16.msra.mxu0 %v1203_v11  ;;  %777 = vmatpush1.bf16.msra.mxu1 %v1239_v59  ;;  %v1260_v9 = vld [vmem:[#allocation8 + $0x80] ss:$8 sps:$4 sm:$0xff]   ;;  %v1261_v10 = vld [vmem:[#allocation8 + $0x94] ss:$8 sps:$4 sm:$0xff]   ;;  %v1263_v11 = vld [vmem:[#allocation8 + $0x90] ss:$8 sps:$4 sm:$0xff]  }
  0x61   :  { %306 = vmatprep.subr.bf16.mxu0 %v1204_v12  ;;  %778 = vmatprep.subr.bf16.mxu1 %v1240_v60  ;;  %v1264_v12 = vld [vmem:[#allocation8 + $0xa4] ss:$8 sps:$4 sm:$0xff]   ;;  %v1266_v13 = vld [vmem:[#allocation8 + $0xa0] ss:$8 sps:$4 sm:$0xff]   ;;  %v1267_v14 = vld [vmem:[#allocation8 + $0xb4] ss:$8 sps:$4 sm:$0xff]  }
  0x62   :  { %v1269_v15 = vld [vmem:[#allocation8 + $0xb0] ss:$8 sps:$4 sm:$0xff]  }
  0x64   :  { %307 = vmatpush1.bf16.msra.mxu0 %v1206_v16  ;;  %779 = vmatpush1.bf16.msra.mxu1 %v1242_v61  ;;  %v1270_v16 = vld [vmem:[#allocation8 + $0xc4] ss:$8 sps:$4 sm:$0xff]  }
  0x65   :  { %308 = vmatprep.subr.bf16.mxu0 %v1207_v17  ;;  %780 = vmatprep.subr.bf16.mxu1 %v1243_v62  ;;  %v1272_v17 = vld [vmem:[#allocation8 + $0xc0] ss:$8 sps:$4 sm:$0xff]  }
  0x68   :  { %309 = vmatpush1.bf16.msra.mxu0 %v1209_v18  ;;  %781 = vmatpush1.bf16.msra.mxu1 %v1245_v63  ;;  %v1273_v18 = vld [vmem:[#allocation8 + $0xd4] ss:$8 sps:$4 sm:$0xff]  }
  0x69   :  { %310 = vmatprep.subr.bf16.mxu0 %v1210_v19  ;;  %782 = vmatprep.subr.bf16.mxu1 %v1246_v0  ;;  %v1275_v19 = vld [vmem:[#allocation8 + $0xd0] ss:$8 sps:$4 sm:$0xff]  }
  0x6c   :  { %311 = vmatpush1.bf16.msra.mxu0 %v1212_v20  ;;  %783 = vmatpush1.bf16.msra.mxu1 %v1248_v1  ;;  %v1276_v20 = vld [vmem:[#allocation8 + $0xe4] ss:$8 sps:$4 sm:$0xff]  }
  0x6d   :  { %312 = vmatprep.subr.bf16.mxu0 %v1213_v21  ;;  %784 = vmatprep.subr.bf16.mxu1 %v1249_v2  ;;  %v1278_v21 = vld [vmem:[#allocation8 + $0xe0] ss:$8 sps:$4 sm:$0xff]  }
  0x70   :  { %313 = vmatpush1.bf16.msra.mxu0 %v1215_v22  ;;  %785 = vmatpush1.bf16.msra.mxu1 %v1251_v3  ;;  %v1279_v22 = vld [vmem:[#allocation8 + $0xf4] ss:$8 sps:$4 sm:$0xff]  }
  0x71   :  { %314 = vmatprep.subr.bf16.mxu0 %v1216_v23  ;;  %786 = vmatprep.subr.bf16.mxu1 %v1252_v4  ;;  %v1281_v23 = vld [vmem:[#allocation8 + $0xf0] ss:$8 sps:$4 sm:$0xff]  }
  0x74   :  { %315 = vmatpush1.bf16.msra.mxu0 %v1218_v24  ;;  %787 = vmatpush1.bf16.msra.mxu1 %v1254_v5 }
  0x75   :  { %316 = vmatprep.subr.bf16.mxu0 %v1219_v25  ;;  %788 = vmatprep.subr.bf16.mxu1 %v1255_v6 }
  0x78   :  { %317 = vmatpush1.bf16.msra.mxu0 %v1221_v26  ;;  %789 = vmatpush1.bf16.msra.mxu1 %v1257_v7 }
  0x79   :  { %318 = vmatprep.subr.bf16.mxu0 %v1222_v27  ;;  %790 = vmatprep.subr.bf16.mxu1 %v1258_v8 }
  0x7c   :  { %319 = vmatpush1.bf16.msra.mxu0 %v1224_v28  ;;  %791 = vmatpush1.bf16.msra.mxu1 %v1260_v9 }
  0x7d   :  { %320 = vmatprep.subr.bf16.mxu0 %v1225_v29  ;;  %792 = vmatprep.subr.bf16.mxu1 %v1261_v10 }
  0x80   :  { %321 = vmatpush1.bf16.msra.mxu0 %v1227_v30  ;;  %793 = vmatpush1.bf16.msra.mxu1 %v1263_v11 }
  0x81   :  { %322 = vmatprep.subr.bf16.mxu0 %v1228_v31  ;;  %794 = vmatprep.subr.bf16.mxu1 %v1264_v12 }
  0x84   :  { %323 = vmatpush1.bf16.msra.mxu0 %v1230_v32  ;;  %795 = vmatpush1.bf16.msra.mxu1 %v1266_v13 }
  0x85   :  { %324 = vmatprep.subr.bf16.mxu0 %v1231_v33  ;;  %796 = vmatprep.subr.bf16.mxu1 %v1267_v14 }
  0x88   :  { %325 = vmatpush1.bf16.msra.mxu0 %v1233_v34  ;;  %797 = vmatpush1.bf16.msra.mxu1 %v1269_v15 }
  0x89   :  { %798 = vmatprep.subr.bf16.mxu1 %v1270_v16 }
  0x8b   :  { %327 = vmatmul.mubr.bf16.vlgmr.msra.gmra.mrb[0].mxu0 %v94_v39 }
  0x8c   :  { %336 = vmatprep.mubr.bf16.mxu0 %v97_v40  ;;  %799 = vmatpush1.bf16.msra.mxu1 %v1272_v17 }
  0x8d   :  { %800 = vmatprep.subr.bf16.mxu1 %v1273_v18 }
  0x90   :  { %801 = vmatpush1.bf16.msra.mxu1 %v1275_v19 }
  0x91   :  { %802 = vmatprep.subr.bf16.mxu1 %v1276_v20 }
  0x93   :  { %337 = vmatmul.mubr.bf16.gmra.mrb[4].mxu0 %v96_v45 }
  0x94   :  { %346 = vmatprep.mubr.bf16.mxu0 %v99_v46  ;;  %803 = vmatpush1.bf16.msra.mxu1 %v1278_v21 }
  0x95   :  { %804 = vmatprep.subr.bf16.mxu1 %v1279_v22 }
  0x98   :  { %805 = vmatpush1.bf16.msra.mxu1 %v1281_v23 }
  0x9b   :  { %347 = vmatmul.mubr.bf16.gmra.mrb[8].mxu0 %v98_v51 }
  0x9c   :  { %356 = vmatprep.mubr.bf16.mxu0 %v101_v52 }
  0xa3   :  { %357 = vmatmul.mubr.bf16.gmra.mrb[12].mxu0 %v100_v55 }
 0x15e   :  { %v328_v24 = vpop.f32.mrb[0].mxu0 }
 0x15f   :  { %v330_v25 = vpop.f32.mrb[1].mxu0 }
 0x160   :  { %v332_v26 = vpop.f32.mrb[2].mxu0 }
 0x161   :  { %v368_v27 = vadd.f32 %v332_v26, %v328_v24  ;;  %v334_v28 = vpop.f32.mrb[3].mxu0 }
 0x162   :  { %v381_v29 = vadd.f32 %v334_v28, %v330_v25 }
 0x166   :  { %v338_v30 = vpop.f32.mrb[4].mxu0 }
 0x167   :  { %v369_v31 = vadd.f32 %v368_v27, %v338_v30  ;;  %v340_v32 = vpop.f32.mrb[5].mxu0 }
 0x168   :  { %v382_v33 = vadd.f32 %v381_v29, %v340_v32  ;;  %v342_v34 = vpop.f32.mrb[6].mxu0 }
 0x169   :  { %v370_v39 = vadd.f32 %v369_v31, %v342_v34  ;;  %v344_v40 = vpop.f32.mrb[7].mxu0 }
 0x16a   :  { %v383_v45 = vadd.f32 %v382_v33, %v344_v40 }
 0x16e   :  { %v348_v46 = vpop.f32.mrb[8].mxu0 }
 0x16f   :  { %v371_v51 = vadd.f32 %v370_v39, %v348_v46  ;;  %v350_v52 = vpop.f32.mrb[9].mxu0 }
 0x170   :  { %v384_v55 = vadd.f32 %v383_v45, %v350_v52  ;;  %v352_v56 = vpop.f32.mrb[10].mxu0 }
 0x171   :  { %v372_v57 = vadd.f32 %v371_v51, %v352_v56  ;;  %v354_v58 = vpop.f32.mrb[11].mxu0 }
 0x172   :  { %v385_v59 = vadd.f32 %v384_v55, %v354_v58 }
 0x176   :  { %v358_v60 = vpop.f32.mrb[12].mxu0 }
 0x177   :  { %v373_v61 = vadd.f32 %v372_v57, %v358_v60  ;;  %v360_v62 = vpop.f32.mrb[13].mxu0 }
 0x178   :  { %v386_v63 = vadd.f32 %v385_v59, %v360_v62  ;;  %v362_v0 = vpop.f32.mrb[14].mxu0 }
 0x179   :  { %v374_v1 = vadd.f32 %v373_v61, %v362_v0  ;;  %v364_v2 = vpop.f32.mrb[15].mxu0 }
 0x17a   :  { %v387_v3 = vadd.f32 %v386_v63, %v364_v2 }
 0x17b   :  { %v375_v4 = vrot.slane %v374_v1, 4 }
 0x17c   :  { %v388_v5 = vrot.slane %v387_v3, 4 }
 0x17d   :  { %v376_v6 = vadd.f32 %v375_v4, %v374_v1 }
 0x17e   :  { %v389_v7 = vadd.f32 %v388_v5, %v387_v3 }
 0x17f   :  { %v377_v8 = vrot.slane %v376_v6, 2 }
 0x180   :  { %v390_v9 = vrot.slane %v389_v7, 2 }
 0x181   :  { %v378_v10 = vadd.f32 %v377_v8, %v376_v6 }
 0x182   :  { %v391_v11 = vadd.f32 %v390_v9, %v389_v7 }
 0x183   :  { %v379_v12 = vrot.slane %v378_v10, 1 }
 0x184   :  { %v392_v13 = vrot.slane %v391_v11, 1 }
 0x185   :  { %v380_v14 = vadd.f32 %v379_v12, %v378_v10 }
 0x186   :  { %v393_v15 = vadd.f32 %v392_v13, %v391_v11 }
 0x187   :  { %v394_v16 = vmul.f32 0.015625, %v380_v14 }
 0x188   :  { %v395_v17 = vmul.f32 0.015625, %v393_v15 }
 0x189   :  { %v1549_v18 = vsub.f32 %v328_v24, %v394_v16  ;;  %v1551_v19 = vsub.f32 %v332_v26, %v394_v16  ;;  %v1553_v20 = vsub.f32 %v338_v30, %v394_v16  ;;  %v1555_v21 = vsub.f32 %v342_v34, %v394_v16 }
 0x18a   :  { %v1557_v22 = vsub.f32 %v348_v46, %v394_v16  ;;  %v1559_v23 = vsub.f32 %v352_v56, %v394_v16  ;;  %v1561_v27 = vsub.f32 %v358_v60, %v394_v16  ;;  %v1563_v29 = vsub.f32 %v362_v0, %v394_v16 }
 0x18b   :  { %v412_v31 = vmul.f32 %v1549_v18, %v1549_v18  ;;  %v414_v24 = vmul.f32 %v1551_v19, %v1551_v19  ;;  %v416_v26 = vmul.f32 %v1553_v20, %v1553_v20  ;;  %v418_v30 = vmul.f32 %v1555_v21, %v1555_v21 }
 0x18c   :  { %v1573_v34 = vsub.f32 %v330_v25, %v395_v17  ;;  %v1575_v39 = vsub.f32 %v334_v28, %v395_v17  ;;  %v1577_v45 = vsub.f32 %v340_v32, %v395_v17  ;;  %v1579_v46 = vsub.f32 %v344_v40, %v395_v17 }
 0x18d   :  { %v428_v33 = vadd.f32 %v414_v24, %v412_v31  ;;  %v1581_v51 = vsub.f32 %v350_v52, %v395_v17  ;;  %v1583_v55 = vsub.f32 %v354_v58, %v395_v17  ;;  %v1585_v56 = vsub.f32 %v360_v62, %v395_v17 }
 0x18e   :  { %v1587_v59 = vsub.f32 %v364_v2, %v395_v17  ;;  %v413_v60 = vmul.f32 %v1573_v34, %v1573_v34  ;;  %v415_v25 = vmul.f32 %v1575_v39, %v1575_v39  ;;  %v420_v28 = vmul.f32 %v1557_v22, %v1557_v22 }
 0x18f   :  { %v429_v57 = vadd.f32 %v428_v33, %v416_v26  ;;  %v417_v40 = vmul.f32 %v1577_v45, %v1577_v45  ;;  %v422_v58 = vmul.f32 %v1559_v23, %v1559_v23  ;;  %v419_v62 = vmul.f32 %v1579_v46, %v1579_v46 }
 0x190   :  { %v441_v52 = vadd.f32 %v415_v25, %v413_v60  ;;  %v424_v0 = vmul.f32 %v1561_v27, %v1561_v27  ;;  %v421_v2 = vmul.f32 %v1581_v51, %v1581_v51  ;;  %v426_v4 = vmul.f32 %v1563_v29, %v1563_v29 }
 0x191   :  { %v430_v32 = vadd.f32 %v429_v57, %v418_v30  ;;  %v423_v6 = vmul.f32 %v1583_v55, %v1583_v55  ;;  %v425_v9 = vmul.f32 %v1585_v56, %v1585_v56  ;;  %v427_v12 = vmul.f32 %v1587_v59, %v1587_v59 }
 0x192   :  { %v442_v63 = vadd.f32 %v441_v52, %v417_v40 }
 0x193   :  { %v431_v61 = vadd.f32 %v430_v32, %v420_v28 }
 0x194   :  { %v443_v3 = vadd.f32 %v442_v63, %v419_v62  ;;  %v466_v62 = vlaneseq }
 0x195   :  { %v432_v1 = vadd.f32 %v431_v61, %v422_v58  ;;  %v1418_v58 = vmov 1983009808  }
 0x196   :  { %v444_v7 = vadd.f32 %v443_v3, %v421_v2  ;;  %v464_v61 = vunpack.c.l.s4 %v1418_v58 }
 0x197   :  { %v433_v5 = vadd.f32 %v432_v1, %v424_v0  ;;  %v1613_v0 = vshrl.u32 %v466_v62, 7 }
 0x198   :  { %v445_v10 = vadd.f32 %v444_v7, %v423_v6  ;;  %v465_v63 = vunpack.c.0.s8 %v464_v61  ;;  %v367_v7 = vld [vmem:[#allocation9] sm:$0xf] }
 0x199   :  { %v434_v8 = vadd.f32 %v433_v5, %v426_v4  ;;  %v1619_v5 = vsub.s32 1, %v1613_v0  ;;  %v514_v6 = vsub.s32 3, %v1613_v0 }
 0x19a   :  { %v446_v13 = vadd.f32 %v445_v10, %v425_v9  ;;  %v1616_v2 = vsub.s32 %v465_v63, %v1613_v0  ;;  %v1624_v9 = vsub.s32 0, %v1613_v0  ;;  %v479_v10 = vsub.s32 2, %v1613_v0 }
 0x19b   :  { %v435_v11 = vrot.slane %v434_v8, 4 }
 0x19c   :  { %v447_v15 = vadd.f32 %v446_v13, %v427_v12  ;;  %v511_v12 = vrot.slane %v367_v7, %v1619_v5  ;;  %v515_v13 = vrot.slane %v367_v7, %v514_v6 }
 0x19d   :  { %v436_v14 = vadd.f32 %v435_v11, %v434_v8 }
 0x19e   :  { %v448_v17 = vrot.slane %v447_v15, 4 }
 0x19f   :  { %v437_v16 = vrot.slane %v436_v14, 2 }
 0x1a0   :  { %v449_v24 = vadd.f32 %v448_v17, %v447_v15 }
 0x1a1   :  { %v438_v31 = vadd.f32 %v437_v16, %v436_v14 }
 0x1a2   :  { %v450_v30 = vrot.slane %v449_v24, 2 }
 0x1a3   :  { %v439_v26 = vrot.slane %v438_v31, 1 }
 0x1a4   :  { %v451_v57 = vadd.f32 %v450_v30, %v449_v24  ;;  %v525_v24 = vrot.slane %v515_v13, %v1619_v5 }
 0x1a5   :  { %v440_v33 = vadd.f32 %v439_v26, %v438_v31  ;;  %v521_v31 = vrot.slane %v511_v12, %v1619_v5 }
 0x1a6   :  { %v452_v25 = vrot.slane %v451_v57, 1 }
 0x1a7   :  { %v454_v60 = vmul.f32 0.015625, %v440_v33 }
 0x1a8   :  { %v453_v32 = vadd.f32 %v452_v25, %v451_v57 }
 0x1a9   :  { %v456_v28 = vadd.f32 1e-05, %v454_v60 }
 0x1aa   :  { %v455_v40 = vmul.f32 0.015625, %v453_v32 }
 0x1ab   :  { %1282 = vrsqrt.f32 %v456_v28 }
 0x1ac   :  { %v457_v52 = vadd.f32 1e-05, %v455_v40 }
 0x1ae   :  { %1284 = vrsqrt.f32 %v457_v52 }
 0x1b5   :  { %v1283_v1 = vpop.eup %1282 }
 0x1b8   :  { %v1285_v3 = vpop.eup %1284 }
 0x1b9   :  { %v462_v4 = vcombine.low %v1283_v1, %v1285_v3 }
 0x1bb   :  { %v469_v8 = vrot.slane %v462_v4, %v1616_v2 }
 0x1bd   :  { %v471_v11 = vmul.f32 %v469_v8, %v367_v7 }
 0x1bf   :  { %v476_v14 = vrot.slane %v471_v11, %v1624_v9  ;;  %v480_v15 = vrot.slane %v471_v11, %v479_v10 }
 0x1c1   :  { %v486_v16 = vrot.slane %v476_v14, %v1624_v9  ;;  %v490_v17 = vrot.slane %v480_v15, %v1624_v9 }
 0x1c3   :  { %v506_v26 = vmul.f32 %v490_v17, %v1587_v59  ;;  %v492_v30 = vmul.f32 %v490_v17, %v1573_v34  ;;  %v494_v33 = vmul.f32 %v490_v17, %v1575_v39  ;;  %v491_v57 = vmul.f32 %v486_v16, %v1549_v18 }
 0x1c4   :  { %v493_v60 = vmul.f32 %v486_v16, %v1551_v19  ;;  %v496_v25 = vmul.f32 %v490_v17, %v1577_v45  ;;  %v498_v28 = vmul.f32 %v490_v17, %v1579_v46  ;;  %v495_v32 = vmul.f32 %v486_v16, %v1553_v20 }
 0x1c5   :  { %v527_v40 = vadd.f32 %v525_v24, %v492_v30  ;;  %v529_v52 = vadd.f32 %v525_v24, %v494_v33  ;;  %v526_v58 = vadd.f32 %v521_v31, %v491_v57  ;;  %v497_v34 = vmul.f32 %v486_v16, %v1555_v21 }
 0x1c6   :  { %v528_v61 = vadd.f32 %v521_v31, %v493_v60  ;;  %v531_v62 = vadd.f32 %v525_v24, %v496_v25  ;;  %v533_v59 = vadd.f32 %v525_v24, %v498_v28  ;;  %v541_v63 = vadd.f32 %v525_v24, %v506_v26 }
 0x1c7   :  { %v543_v39 = vmax.f32 %v527_v40, 0.0  ;;  %v545_v1 = vmax.f32 %v529_v52, 0.0  ;;  %v542_v18 = vmax.f32 %v526_v58, 0.0  ;;  %v530_v45 = vadd.f32 %v521_v31, %v495_v32 }
 0x1c8   :  { %v544_v3 = vmax.f32 %v528_v61, 0.0  ;;  %v547_v19 = vmax.f32 %v531_v62, 0.0  ;;  %v549_v4 = vmax.f32 %v533_v59, 0.0  ;;  %v532_v46 = vadd.f32 %v521_v31, %v497_v34 }
 0x1c9   :  { %v559_v7 = vpack.c.bf16 %v545_v1, %v543_v39  ;;  %v500_v20 = vmul.f32 %v490_v17, %v1581_v51  ;;  %v502_v8 = vmul.f32 %v490_v17, %v1583_v55  ;;  %v546_v13 = vmax.f32 %v530_v45, 0.0 }
 0x1ca   :  { %v558_v11 = vpack.c.bf16 %v544_v3, %v542_v18  ;;  %v561_v12 = vpack.c.bf16 %v549_v4, %v547_v19  ;;  %v499_v14 = vmul.f32 %v486_v16, %v1557_v22  ;;  %v548_v21 = vmax.f32 %v532_v46, 0.0 }
 0x1cb   :  { %806 = vmatprep.mubr.bf16.mxu1 %v559_v7  ;;  %v535_v15 = vadd.f32 %v525_v24, %v500_v20  ;;  %v537_v26 = vadd.f32 %v525_v24, %v502_v8  ;;  %v501_v30 = vmul.f32 %v486_v16, %v1559_v23  ;;  %v504_v57 = vmul.f32 %v490_v17, %v1585_v56 }
 0x1cc   :  { %807 = vmatmul.mubr.bf16.vlgmr.msra.gmra.mrb[0].mxu1 %v558_v11  ;;  %v534_v33 = vadd.f32 %v521_v31, %v499_v14  ;;  %v560_v60 = vpack.c.bf16 %v548_v21, %v546_v13  ;;  %v557_v28 = vmax.f32 %v541_v63, 0.0  ;;  %v503_v23 = vmul.f32 %v486_v16, %v1561_v27 }
 0x1cd   :  { %816 = vmatprep.mubr.bf16.mxu1 %v561_v12  ;;  %v551_v51 = vmax.f32 %v535_v15, 0.0  ;;  %v553_v25 = vmax.f32 %v537_v26, 0.0  ;;  %v536_v55 = vadd.f32 %v521_v31, %v501_v30  ;;  %v539_v40 = vadd.f32 %v525_v24, %v504_v57 }
 0x1ce   :  { %v550_v32 = vmax.f32 %v534_v33, 0.0  ;;  %v505_v59 = vmul.f32 %v486_v16, %v1563_v29  ;;  %v538_v56 = vadd.f32 %v521_v31, %v503_v23 }
 0x1cf   :  { %v563_v52 = vpack.c.bf16 %v553_v25, %v551_v51  ;;  %v552_v22 = vmax.f32 %v536_v55, 0.0  ;;  %v555_v58 = vmax.f32 %v539_v40, 0.0 }
 0x1d0   :  { %v540_v17 = vadd.f32 %v521_v31, %v505_v59  ;;  %v554_v34 = vmax.f32 %v538_v56, 0.0 }
 0x1d1   :  { %v562_v61 = vpack.c.bf16 %v552_v22, %v550_v32  ;;  %v565_v62 = vpack.c.bf16 %v557_v28, %v555_v58 }
 0x1d2   :  { %v556_v39 = vmax.f32 %v540_v17, 0.0 }
 0x1d4   :  { %817 = vmatmul.mubr.bf16.gmra.mrb[4].mxu1 %v560_v60  ;;  %v564_v63 = vpack.c.bf16 %v556_v39, %v554_v34 }
 0x1d5   :  { %826 = vmatprep.mubr.bf16.mxu1 %v563_v52 }
 0x1dc   :  { %827 = vmatmul.mubr.bf16.gmra.mrb[8].mxu1 %v562_v61 }
 0x1dd   :  { %836 = vmatprep.mubr.bf16.mxu1 %v565_v62 }
 0x1e4   :  { %837 = vmatmul.mubr.bf16.gmra.mrb[12].mxu1 %v564_v63 }
 0x29f   :  { %v808_v24 = vpop.f32.mrb[0].mxu1 }
 0x2a0   :  { %v810_v1 = vpop.f32.mrb[1].mxu1 }
 0x2a1   :  { %v812_v18 = vpop.f32.mrb[2].mxu1 }
 0x2a2   :  { %v848_v3 = vadd.f32 %v812_v18, %v808_v24  ;;  %v814_v19 = vpop.f32.mrb[3].mxu1 }
 0x2a3   :  { %v861_v4 = vadd.f32 %v814_v19, %v810_v1 }
 0x2a7   :  { %v818_v45 = vpop.f32.mrb[4].mxu1 }
 0x2a8   :  { %v849_v7 = vadd.f32 %v848_v3, %v818_v45  ;;  %v820_v46 = vpop.f32.mrb[5].mxu1 }
 0x2a9   :  { %v862_v27 = vadd.f32 %v861_v4, %v820_v46  ;;  %v822_v20 = vpop.f32.mrb[6].mxu1 }
 0x2aa   :  { %v850_v29 = vadd.f32 %v849_v7, %v822_v20  ;;  %v824_v16 = vpop.f32.mrb[7].mxu1 }
 0x2ab   :  { %v863_v31 = vadd.f32 %v862_v27, %v824_v16 }
 0x2af   :  { %v828_v8 = vpop.f32.mrb[8].mxu1 }
 0x2b0   :  { %v851_v11 = vadd.f32 %v850_v29, %v828_v8  ;;  %v830_v12 = vpop.f32.mrb[9].mxu1 }
 0x2b1   :  { %v864_v13 = vadd.f32 %v863_v31, %v830_v12  ;;  %v832_v14 = vpop.f32.mrb[10].mxu1 }
 0x2b2   :  { %v852_v21 = vadd.f32 %v851_v11, %v832_v14  ;;  %v834_v15 = vpop.f32.mrb[11].mxu1 }
 0x2b3   :  { %v865_v26 = vadd.f32 %v864_v13, %v834_v15 }
 0x2b7   :  { %v838_v30 = vpop.f32.mrb[12].mxu1 }
 0x2b8   :  { %v853_v33 = vadd.f32 %v852_v21, %v838_v30  ;;  %v840_v57 = vpop.f32.mrb[13].mxu1 }
 0x2b9   :  { %v866_v60 = vadd.f32 %v865_v26, %v840_v57  ;;  %v842_v51 = vpop.f32.mrb[14].mxu1 }
 0x2ba   :  { %v854_v25 = vadd.f32 %v853_v33, %v842_v51  ;;  %v844_v55 = vpop.f32.mrb[15].mxu1 }
 0x2bb   :  { %v867_v28 = vadd.f32 %v866_v60, %v844_v55 }
 0x2bc   :  { %v855_v32 = vrot.slane %v854_v25, 4 }
 0x2bd   :  { %v868_v40 = vrot.slane %v867_v28, 4 }
 0x2be   :  { %v856_v52 = vadd.f32 %v855_v32, %v854_v25 }
 0x2bf   :  { %v869_v22 = vadd.f32 %v868_v40, %v867_v28 }
 0x2c0   :  { %v857_v58 = vrot.slane %v856_v52, 2 }
 0x2c1   :  { %v870_v61 = vrot.slane %v869_v22, 2 }
 0x2c2   :  { %v858_v62 = vadd.f32 %v857_v58, %v856_v52 }
 0x2c3   :  { %v871_v23 = vadd.f32 %v870_v61, %v869_v22 }
 0x2c4   :  { %v859_v59 = vrot.slane %v858_v62, 1 }
 0x2c5   :  { %v872_v56 = vrot.slane %v871_v23, 1 }
 0x2c6   :  { %v860_v17 = vadd.f32 %v859_v59, %v858_v62 }
 0x2c7   :  { %v873_v34 = vadd.f32 %v872_v56, %v871_v23 }
 0x2c8   :  { %v874_v39 = vmul.f32 0.015625, %v860_v17 }
 0x2c9   :  { %v875_v63 = vmul.f32 0.015625, %v873_v34 }
 0x2ca   :  { %v1653_v3 = vsub.f32 %v808_v24, %v874_v39  ;;  %v1655_v4 = vsub.f32 %v812_v18, %v874_v39  ;;  %v1657_v7 = vsub.f32 %v818_v45, %v874_v39  ;;  %v1659_v27 = vsub.f32 %v822_v20, %v874_v39 }
 0x2cb   :  { %v1661_v29 = vsub.f32 %v828_v8, %v874_v39  ;;  %v1663_v31 = vsub.f32 %v832_v14, %v874_v39  ;;  %v1665_v11 = vsub.f32 %v838_v30, %v874_v39  ;;  %v1667_v13 = vsub.f32 %v842_v51, %v874_v39 }
 0x2cc   :  { %v892_v21 = vmul.f32 %v1653_v3, %v1653_v3  ;;  %v894_v24 = vmul.f32 %v1655_v4, %v1655_v4  ;;  %v896_v18 = vmul.f32 %v1657_v7, %v1657_v7  ;;  %v898_v45 = vmul.f32 %v1659_v27, %v1659_v27 }
 0x2cd   :  { %v1677_v8 = vsub.f32 %v810_v1, %v875_v63  ;;  %v1679_v14 = vsub.f32 %v814_v19, %v875_v63  ;;  %v1681_v26 = vsub.f32 %v820_v46, %v875_v63  ;;  %v1683_v30 = vsub.f32 %v824_v16, %v875_v63 }
 0x2ce   :  { %v908_v20 = vadd.f32 %v894_v24, %v892_v21  ;;  %v1685_v33 = vsub.f32 %v830_v12, %v875_v63  ;;  %v1687_v60 = vsub.f32 %v834_v15, %v875_v63  ;;  %v1689_v51 = vsub.f32 %v840_v57, %v875_v63 }
 0x2cf   :  { %v1691_v28 = vsub.f32 %v844_v55, %v875_v63  ;;  %v893_v32 = vmul.f32 %v1677_v8, %v1677_v8  ;;  %v895_v1 = vmul.f32 %v1679_v14, %v1679_v14  ;;  %v900_v19 = vmul.f32 %v1661_v29, %v1661_v29 }
 0x2d0   :  { %v909_v25 = vadd.f32 %v908_v20, %v896_v18  ;;  %v897_v16 = vmul.f32 %v1681_v26, %v1681_v26  ;;  %v902_v15 = vmul.f32 %v1663_v31, %v1663_v31  ;;  %v899_v55 = vmul.f32 %v1683_v30, %v1683_v30 }
 0x2d1   :  { %v921_v12 = vadd.f32 %v895_v1, %v893_v32  ;;  %v904_v52 = vmul.f32 %v1665_v11, %v1665_v11  ;;  %v901_v58 = vmul.f32 %v1685_v33, %v1685_v33  ;;  %v906_v62 = vmul.f32 %v1667_v13, %v1667_v13 }
 0x2d2   :  { %v910_v46 = vadd.f32 %v909_v25, %v898_v45  ;;  %v903_v59 = vmul.f32 %v1687_v60, %v1687_v60  ;;  %v905_v34 = vmul.f32 %v1689_v51, %v1689_v51  ;;  %v907_v21 = vmul.f32 %v1691_v28, %v1691_v28 }
 0x2d3   :  { %v922_v40 = vadd.f32 %v921_v12, %v897_v16 }
 0x2d4   :  { %v911_v57 = vadd.f32 %v910_v46, %v900_v19 }
 0x2d5   :  { %v923_v61 = vadd.f32 %v922_v40, %v899_v55 }
 0x2d6   :  { %v912_v22 = vadd.f32 %v911_v57, %v902_v15 }
 0x2d7   :  { %v924_v56 = vadd.f32 %v923_v61, %v901_v58 }
 0x2d8   :  { %v913_v23 = vadd.f32 %v912_v22, %v904_v52 }
 0x2d9   :  { %v925_v39 = vadd.f32 %v924_v56, %v903_v59 }
 0x2da   :  { %v914_v17 = vadd.f32 %v913_v23, %v906_v62  ;;  %v847_v23 = vld [vmem:[%s1780_s4] sm:$0xf]  ;;  %s1419_s4 = smov [#allocation11]  }
 0x2db   :  { %v926_v24 = vadd.f32 %v925_v39, %v905_v34  ;;  %v995_v34 = vrot.slane %v847_v23, %v514_v6  ;;  %s1096_s19 = sshll.u32 %s1419_s4, 4  ;;  %s1097_s19 = int_to_ptr.vmem [resolvable:$true] %s1096_s19 }
 0x2dc   :  { %v915_v63 = vrot.slane %v914_v17, 4  ;;  %s1380_s20 = scalar_lea.vmem %s1097_s19, 2048  ;;  %p1385_p5 = scmp.lt.s32.totalorder %s1097_s19, %s1097_s19 }
 0x2dd   :  { %v927_v45 = vadd.f32 %v926_v24, %v907_v21  ;;  %p1381_p4 = scmp.ne.s32.totalorder %s1097_s19, %s1380_s20  ;;  %p1386_p6 = scmp.lt.s32.totalorder %s1380_s20, %s1380_s20 }
 0x2de   :  { %v916_v18 = vadd.f32 %v915_v63, %v914_v17  ;;  %v991_v17 = vrot.slane %v847_v23, %v1619_v5 }
 0x2df   :  { %v928_v25 = vrot.slane %v927_v45, 4  ;;  %p1387_p7 = por %p1386_p6, %p1385_p5 }
 0x2e0   :  { %v917_v20 = vrot.slane %v916_v18, 2 }
 0x2e1   :  { %v929_v1 = vadd.f32 %v928_v25, %v927_v45  ;;  %v1005_v45 = vrot.slane %v995_v34, %v1619_v5  ;;  %p1388_p8 = pnand %p1387_p7, %p1381_p4 }
 0x2e2   :  { %v918_v32 = vadd.f32 %v917_v20, %v916_v18  ;;  %v1001_v18 = vrot.slane %v991_v17, %v1619_v5 }
 0x2e3   :  { %v930_v46 = vrot.slane %v929_v1, 2 }
 0x2e4   :  { %v919_v19 = vrot.slane %v918_v32, 1 }
 0x2e5   :  { %v931_v12 = vadd.f32 %v930_v46, %v929_v1 }
 0x2e6   :  { %v920_v16 = vadd.f32 %v919_v19, %v918_v32 }
 0x2e7   :  { %v932_v57 = vrot.slane %v931_v12, 1 }
 0x2e8   :  { %v934_v15 = vmul.f32 0.015625, %v920_v16 }
 0x2e9   :  { %v933_v40 = vadd.f32 %v932_v57, %v931_v12 }
 0x2ea   :  { %v936_v55 = vadd.f32 1e-05, %v934_v15 }
 0x2eb   :  { %v935_v52 = vmul.f32 0.015625, %v933_v40 }
 0x2ec   :  { %1286 = vrsqrt.f32 %v936_v55 }
 0x2ed   :  { %v937_v22 = vadd.f32 1e-05, %v935_v52 }
 0x2ef   :  { %1288 = vrsqrt.f32 %v937_v22 }
 0x2f6   :  { %v1287_v58 = vpop.eup %1286 }
 0x2f9   :  { %v1289_v61 = vpop.eup %1288 }
 0x2fa   :  { %v942_v62 = vcombine.low %v1287_v58, %v1289_v61 }
 0x2fc   :  { %v949_v59 = vrot.slane %v942_v62, %v1616_v2 }
 0x2fe   :  { %v951_v56 = vmul.f32 %v949_v59, %v847_v23 }
 0x300   :  { %v956_v39 = vrot.slane %v951_v56, %v1624_v9  ;;  %v960_v63 = vrot.slane %v951_v56, %v479_v10 }
 0x302   :  { %v966_v21 = vrot.slane %v956_v39, %v1624_v9  ;;  %v970_v24 = vrot.slane %v960_v63, %v1624_v9 }
 0x304   :  { %v971_v2 = vmul.f32 %v966_v21, %v1653_v3  ;;  %v972_v20 = vmul.f32 %v970_v24, %v1677_v8  ;;  %v973_v25 = vmul.f32 %v966_v21, %v1655_v4  ;;  %v974_v6 = vmul.f32 %v970_v24, %v1679_v14 }
 0x305   :  { %v975_v32 = vmul.f32 %v966_v21, %v1657_v7  ;;  %v976_v0 = vmul.f32 %v970_v24, %v1681_v26  ;;  %v977_v10 = vmul.f32 %v966_v21, %v1659_v27  ;;  %v978_v9 = vmul.f32 %v970_v24, %v1683_v30 }
 0x306   :  { %v979_v1 = vmul.f32 %v966_v21, %v1661_v29  ;;  %v980_v5 = vmul.f32 %v970_v24, %v1685_v33  ;;  %v981_v3 = vmul.f32 %v966_v21, %v1663_v31  ;;  %v982_v8 = vmul.f32 %v970_v24, %v1687_v60 }
 0x307   :  { %v983_v4 = vmul.f32 %v966_v21, %v1665_v11  ;;  %v984_v14 = vmul.f32 %v970_v24, %v1689_v51  ;;  %v985_v7 = vmul.f32 %v966_v21, %v1667_v13  ;;  %v986_v26 = vmul.f32 %v970_v24, %v1691_v28 }
 0x308   :  { %v1006_v19 = vadd.f32 %v1001_v18, %v971_v2  ;;  %v1007_v27 = vadd.f32 %v1005_v45, %v972_v20  ;;  %v1008_v46 = vadd.f32 %v1001_v18, %v973_v25  ;;  %v1009_v30 = vadd.f32 %v1005_v45, %v974_v6  ;;  %v1291_v25 = vld [vmem:[#allocation3 + $0x18] sm:$0xff] }
 0x309   :  { %v1010_v16 = vadd.f32 %v1001_v18, %v975_v32  ;;  %v1011_v29 = vadd.f32 %v1005_v45, %v976_v0  ;;  %v1012_v12 = vadd.f32 %v1001_v18, %v977_v10  ;;  %v1013_v33 = vadd.f32 %v1005_v45, %v978_v9 }
 0x30a   :  { %v1014_v15 = vadd.f32 %v1001_v18, %v979_v1  ;;  %v1015_v31 = vadd.f32 %v1005_v45, %v980_v5  ;;  %v1016_v57 = vadd.f32 %v1001_v18, %v981_v3  ;;  %v1017_v60 = vadd.f32 %v1005_v45, %v982_v8 }
 0x30b   :  { %v1018_v55 = vadd.f32 %v1001_v18, %v983_v4  ;;  %v1019_v11 = vadd.f32 %v1005_v45, %v984_v14  ;;  %v1020_v40 = vadd.f32 %v1001_v18, %v985_v7  ;;  %v1021_v51 = vadd.f32 %v1005_v45, %v986_v26  ;;  %v1290_v18 = vld [vmem:[#allocation3 + $0x8] sm:$0xff] }
 0x30c   :  { %v1022_v52 = vmax.f32 %v1006_v19, 0.0  ;;  %v1023_v13 = vmax.f32 %v1007_v27, 0.0  ;;  %v1024_v22 = vmax.f32 %v1008_v46, 0.0  ;;  %v1025_v28 = vmax.f32 %v1009_v30, 0.0 }
 0x30d   :  { %v1026_v58 = vmax.f32 %v1010_v16, 0.0  ;;  %v1027_v61 = vmax.f32 %v1011_v29, 0.0  ;;  %v1028_v62 = vmax.f32 %v1012_v12, 0.0  ;;  %v1029_v23 = vmax.f32 %v1013_v33, 0.0 }
 0x30e   :  { %v1030_v59 = vmax.f32 %v1014_v15, 0.0  ;;  %v1031_v56 = vmax.f32 %v1015_v31, 0.0  ;;  %v1032_v17 = vmax.f32 %v1016_v57, 0.0  ;;  %v1033_v34 = vmax.f32 %v1017_v60, 0.0 }
 0x30f   :  { %v1034_v39 = vmax.f32 %v1018_v55, 0.0  ;;  %v1035_v63 = vmax.f32 %v1019_v11, 0.0  ;;  %v1036_v21 = vmax.f32 %v1020_v40, 0.0  ;;  %v1037_v24 = vmax.f32 %v1021_v51, 0.0 }
 0x310   :  { %v1059_v2 = vadd.f32 %v1022_v52, %v1507_v35  ;;  %v1060_v45 = vadd.f32 %v1290_v18, %v1023_v13  ;;  %v1061_v20 = vadd.f32 %v1024_v22, %v1509_v36  ;;  %v1062_v6 = vadd.f32 %v1291_v25, %v1025_v28 }
 0x311   :  { %v1063_v32 = vadd.f32 %v1026_v58, %v1519_v41  ;;  %v1064_v0 = vadd.f32 %v1027_v61, %v1511_v37  ;;  %v1065_v10 = vadd.f32 %v1028_v62, %v1521_v42  ;;  %v1066_v9 = vadd.f32 %v1029_v23, %v1513_v38 }
 0x312   :  { %v1067_v1 = vadd.f32 %v1030_v59, %v1531_v47  ;;  %v1068_v35 = vadd.f32 %v1031_v56, %v1523_v43  ;;  %v1069_v5 = vadd.f32 %v1032_v17, %v1533_v48  ;;  %v1070_v36 = vadd.f32 %v1033_v34, %v1525_v44  ;;  %1075 = vst [vmem:[#allocation11] sm:$0xff] %v1059_v2 }
 0x313   :  { %1076 = vst [vmem:[#allocation11 + $0x8] sm:$0xff] %v1060_v45  ;;  %1077 = vst [vmem:[#allocation11 + $0x10] sm:$0xff] %v1061_v20  ;;  %v1071_v41 = vadd.f32 %v1034_v39, %v1543_v53  ;;  %v1072_v37 = vadd.f32 %v1035_v63, %v1535_v49  ;;  %v1073_v42 = vadd.f32 %v1036_v21, %v1545_v54 }
 0x314   :  { %1078 = vst [vmem:[#allocation11 + $0x18] sm:$0xff] %v1062_v6  ;;  %v1074_v38 = vadd.f32 %v1037_v24, %v1537_v50  ;;  %1079 = vst [vmem:[#allocation11 + $0x20] sm:$0xff] %v1063_v32 }
 0x315   :  { %1080 = vst [vmem:[#allocation11 + $0x28] sm:$0xff] %v1064_v0  ;;  %1081 = vst [vmem:[#allocation11 + $0x30] sm:$0xff] %v1065_v10 }
 0x316   :  { %1082 = vst [vmem:[#allocation11 + $0x38] sm:$0xff] %v1066_v9  ;;  %1083 = vst [vmem:[#allocation11 + $0x40] sm:$0xff] %v1067_v1 }
 0x317   :  { %1084 = vst [vmem:[#allocation11 + $0x48] sm:$0xff] %v1068_v35  ;;  %1085 = vst [vmem:[#allocation11 + $0x50] sm:$0xff] %v1069_v5 }
 0x318   :  { %1086 = vst [vmem:[#allocation11 + $0x58] sm:$0xff] %v1070_v36  ;;  %1087 = vst [vmem:[#allocation11 + $0x60] sm:$0xff] %v1071_v41 }
 0x319   :  { %1088 = vst [vmem:[#allocation11 + $0x68] sm:$0xff] %v1072_v37  ;;  %1089 = vst [vmem:[#allocation11 + $0x70] sm:$0xff] %v1073_v42 }
 0x31a   :  { %1090 = vst [vmem:[#allocation11 + $0x78] sm:$0xff] %v1074_v38 }
 0x31b   :  { %1391 = shalt.err (!%p1388_p8)
}
 0x31c   :  { %s1392_s23 = scalar_lea.hbm %s1781_s5, 2048 }
 0x31d   :  { %p1393_p9 = scmp.ne.s32.totalorder %s1781_s5, %s1392_s23  ;;  %p1396_p10 = scmp.lt.u32.totalorder %s1392_s23, %s1781_s5 }
 0x31f   :  { %p1398_p11 = pnand %p1396_p10, %p1393_p9 }
 0x321   :  { %1401 = shalt.err (!%p1398_p11)
}
 0x322   :  { %1102 = dma.vmem_to_hbm [thread:$0]  %s1097_s19, 2048, %s1781_s5, [#allocation5], %s1414_s1, %s1414_s1, %s1415_s17  }
 0x323   :  { %1408 = dma.done.wait [#allocation5], 2048  }
 0x324   :  { %1409 = vsyncadd [#allocation5], 4294965248 }
 0x325   :  { %1106 = vsyncpa [#allocation4], 1 }
 0x326   :  { %1107 = vsyncpa [#allocation7], 1 }
 0x327   :  { %1108 = vsyncpa [#allocation10], 1 }
 0x328   :  { %1109 = vsyncpa [#allocation5], 1 }

</bundles_post_ra>
